<compile_context>
chip_gen: v7x
topology: tpu7x:2x2x1
jax: 0.10.0
libtpu: 0.0.40
codegen_flags: <defaults>
</compile_context>

<pallas_src>
import math

import jax
import jax.numpy as jnp
import numpy as np
from jax import lax
from jax.experimental import pallas as pl
from jax.experimental.pallas import tpu as pltpu


# ----------------------------------------------------------------------------
# Glue: cardinal B-spline basis and kernel sampling (mirrors x_h_centers_init
# for the dense N=None case, where centers factorize into xgrid x hgrid).
# ----------------------------------------------------------------------------
def cardinal_bspline(x, n):
    """Centered cardinal B-spline of order n, support [-(n+1)/2, (n+1)/2]."""
    half = (n + 1) / 2.0
    acc = jnp.zeros_like(x)
    for k in range(n + 2):
        coef = ((-1.0) ** k) * math.comb(n + 1, k) / math.factorial(n)
        acc = acc + coef * jnp.maximum(x + half - k, 0.0) ** n
    return jnp.where(jnp.abs(x) <= half, acc, 0.0)


def sample_gg_kernel(weights, scales, kernel_size, V, b_order, b_scale):
    """Sample the group-transformed B-spline kernel stack.

    weights : [Cout, Cin, Nh, size] coefficients at the dense (h-major, x-minor)
              centers produced by x_h_centers_init(N=None).
    returns K : [Nh_out, Cout, Cin, Nh_in, V]
    """
    Cout, Cin, Nh, size = weights.shape
    x_max = kernel_size // 2
    x_min = x_max - kernel_size + 1
    xgrid = jnp.arange(x_min, x_max + 1, dtype=jnp.float32)            # spatial centers [size]
    xx = jnp.arange(V, dtype=jnp.float32) - (V // 2)                   # sampled offsets [V]

    # Spatial axis: inverse scale action x -> x / a_j, then cardinal B-spline.
    Bx = cardinal_bspline(
        (xx[None, None, :] / scales[:, None, None] - xgrid[None, :, None]) / b_scale,
        b_order)                                                       # [Nh_out, size, V]

    # Group (scale) axis in log-base coordinates (grid spacing 1); inverse action
    # of output element j is a shift by -j.  Bh[j, kh, i] = B(i - j - kh).
    # TODO(synk): eerie may use a distinct B-spline scale on the H axis; grid spacing 1.0 used here.
    idx = jnp.arange(Nh, dtype=jnp.float32)
    Bh = cardinal_bspline(idx[None, None, :] - idx[:, None, None] - idx[None, :, None], b_order)

    K = jnp.einsum('ochk,jhi,jkv->jociv', weights, Bh, Bx)
    # Haar-measure normalization of the dilated spatial kernel: k_a(x) = (1/a) k(x/a).
    K = K / scales[:, None, None, None, None]
    return K


def _round_up(a, m):
    return (a + m - 1) // m * m


# ----------------------------------------------------------------------------
# Pallas forward: grid = (batch, x-tiles).  Each program loads the current x
# tile plus the next tile (halo), assembles them in a VMEM scratch, and runs
# V shifted-window matmuls (bf16 in, f32 accumulate) + f32 bias add.
# ----------------------------------------------------------------------------
def gconv_gg(x, weights, bias, scales, *, kernel_size, b_order=2, b_scale=1.0,
             padding=0, b_padding=True, stride=1, dilation=1,
             compute_dtype=jnp.bfloat16, x_tile=512):
    """GConvGG.forward — G->G conv for the 1-D scale-translation group.

    x: [B, Cin, Nh_in, X], weights: [Cout, Cin, Nh, kernel_size], bias: [Cout],
    scales: [Nh] (h_grid, scales[i] = base**i).  Returns [B, Cout, Nh_out, X_out].
    """
    assert stride == 1  # TODO(synk): stride marked "not implemented" in the reference module.
    # TODO(synk): h_crop / b_groups>1 / adaptive_basis / random-N centers not implemented (defaults used).
    B, Cin, Nh_in, X = x.shape
    Cout, Cin_w, Nh, size = weights.shape
    assert Cin_w == Cin and Nh_in == Nh and size == kernel_size

    # virtual_kernel_size as computed in GConvGG.__init__
    x_max = kernel_size // 2
    max_scaling = float(np.max(np.asarray(scales)))
    V = int(round(max_scaling * x_max)) * 2 + 1

    K = sample_gg_kernel(weights.astype(jnp.float32), scales.astype(jnp.float32),
                         kernel_size, V, b_order, b_scale)      # [Nh, Cout, Cin, Nh_in, V]

    CK = Cin * Nh_in                    # folded (in-channel, in-scale) contraction
    M = Cout * Nh                       # folded (out-channel, out-scale) rows, m = o*Nh + j
    # k_taps[v, o*Nh + j, cin*Nh_in + hin] = K[j, o, cin, hin, v]
    k_taps = jnp.transpose(K, (4, 1, 0, 2, 3)).reshape(V, M, CK)

    halo = (V - 1) * dilation
    pad = padding + (halo // 2 if b_padding else 0)
    X_pad = X + 2 * pad
    X_out = X_pad - halo
    assert X_out > 0

    M_pad = _round_up(M, 8)                              # sublane-aligned rows
    CK_pad = _round_up(CK, 16)                           # bf16-friendly contraction rows
    TXT = min(x_tile, _round_up(X_pad, 128))             # lane-dense x tile
    TXT = max(TXT, _round_up(halo, 128))                 # halo must fit in one extra tile
    n_xt = pl.cdiv(X_out, TXT)
    X_cols = (n_xt + 1) * TXT                            # +1 tile so the halo block is in-bounds

    k_taps_p = jnp.zeros((V, M_pad, CK_pad), compute_dtype).at[:, :M, :CK].set(
        k_taps.astype(compute_dtype))
    bias_rows = jnp.zeros((M_pad, 1), jnp.float32).at[:M, 0].set(
        jnp.repeat(bias.astype(jnp.float32), Nh))        # row m = o*Nh + j -> bias[o]
    x_p = jnp.zeros((B, CK_pad, X_cols), compute_dtype).at[:, :CK, pad:pad + X].set(
        x.reshape(B, CK, X).astype(compute_dtype))

    def _kernel(k_ref, b_ref, x0_ref, x1_ref, o_ref, xcat_ref):
        # k_ref : [V, M_pad, CK_pad] bf16     b_ref : [M_pad, 1] f32
        # x0/x1 : [1, CK_pad, TXT]   bf16     o_ref : [1, M_pad, TXT] f32
        # xcat  : [CK_pad, 2*TXT]    bf16 scratch (current tile + halo tile)
        xcat_ref[:, :TXT] = x0_ref[0]
        xcat_ref[:, TXT:] = x1_ref[0]
        acc = jnp.dot(k_ref[0], xcat_ref[:, 0:TXT],
                      preferred_element_type=jnp.float32)
        for v in range(1, V):                            # unrolled: V shifted-window matmuls
            s = v * dilation
            acc = acc + jnp.dot(k_ref[v], xcat_ref[:, s:s + TXT],
                                preferred_element_type=jnp.float32)
        o_ref[0] = acc + b_ref[...]

    out_arr = pl.pallas_call(
        _kernel,
        out_shape=jax.ShapeDtypeStruct((B, M_pad, n_xt * TXT), jnp.float32),
        grid=(B, n_xt),
        in_specs=[
            pl.BlockSpec((V, M_pad, CK_pad), lambda b, n: (0, 0, 0)),   # sampled kernel taps
            pl.BlockSpec((M_pad, 1), lambda b, n: (0, 0)),              # bias (per row)
            pl.BlockSpec((1, CK_pad, TXT), lambda b, n: (b, 0, n)),     # current x tile
            pl.BlockSpec((1, CK_pad, TXT), lambda b, n: (b, 0, n + 1)), # halo (next) x tile
        ],
        out_specs=pl.BlockSpec((1, M_pad, TXT), lambda b, n: (b, 0, n)),
        scratch_shapes=[pltpu.VMEM((CK_pad, 2 * TXT), compute_dtype)],
        compiler_params=pltpu.CompilerParams(
            dimension_semantics=("parallel", "parallel"),
            vmem_limit_bytes=64 * 1024 * 1024),
    )(k_taps_p, bias_rows, x_p, x_p)

    # Rows are (Cout-major, Nh-minor) so this is slice + free reshape, no transpose.
    out = out_arr[:, :M, :X_out].reshape(B, Cout, Nh, X_out)
    return out


# ----------------------------------------------------------------------------
# Pure-JAX reference (same glue, lax.conv for the hot path) for validation.
# Uses the same compute dtype so the comparison is apples-to-apples.
# ----------------------------------------------------------------------------
def gconv_gg_ref(x, weights, bias, scales, *, kernel_size, b_order=2, b_scale=1.0,
                 padding=0, b_padding=True, dilation=1, compute_dtype=jnp.bfloat16):
    B, Cin, Nh, X = x.shape
    Cout = weights.shape[0]
    x_max = kernel_size // 2
    V = int(round(float(np.max(np.asarray(scales))) * x_max)) * 2 + 1
    K = sample_gg_kernel(weights.astype(jnp.float32), scales.astype(jnp.float32),
                         kernel_size, V, b_order, b_scale)
    CK = Cin * Nh
    k_flat = jnp.transpose(K, (0, 4, 1, 2, 3)).reshape(Nh, V, Cout, CK)
    pad = padding + (((V - 1) * dilation) // 2 if b_padding else 0)
    x_flat = jnp.pad(x.astype(jnp.float32).reshape(B, CK, X), ((0, 0), (0, 0), (pad, pad)))
    x_flat = x_flat.astype(compute_dtype)
    outs = []
    for j in range(Nh):
        rhs = jnp.transpose(k_flat[j], (1, 2, 0)).astype(compute_dtype)   # [Cout, CK, V]
        o = lax.conv_general_dilated(x_flat, rhs, window_strides=(1,), padding='VALID',
                                     rhs_dilation=(dilation,),
                                     dimension_numbers=('NCH', 'OIH', 'NCH'),
                                     preferred_element_type=jnp.float32)
        outs.append(o)
    out = jnp.stack(outs, axis=2)                        # [B, Cout, Nh, X_out]
    return out + bias.astype(jnp.float32)[None, :, None, None]


if __name__ == "__main__":
    key = jax.random.PRNGKey(0)
    k_w, k_b, k_x = jax.random.split(key, 3)

    # Small shapes consistent with the module (d = 1 scale-translation group).
    B, Cin, Cout, Nh, X, ksize = 2, 4, 4, 3, 32, 5
    d = 1
    base = 2.0
    scales = jnp.asarray(base ** np.arange(Nh), dtype=jnp.float32)   # h_grid

    # Deterministic parameter init mirroring GConvGG.__init__/_reset_parameters.
    stdv = math.sqrt(2.0) / math.sqrt(Cin * ksize ** d)
    weights = jax.random.uniform(k_w, (Cout, Cin, Nh, ksize), jnp.float32,
                                 minval=-stdv, maxval=stdv)
    bias = jax.random.normal(k_b, (Cout,), jnp.float32)

    x = jax.random.normal(k_x, (B, Cin, Nh, X), jnp.float32)

    out = gconv_gg(x, weights, bias, scales, kernel_size=ksize)
    out = jax.block_until_ready(out)

    ref = gconv_gg_ref(x, weights, bias, scales, kernel_size=ksize)
    # Both paths use bf16 inputs with f32 accumulation; only summation order differs.
    np.testing.assert_allclose(np.asarray(out), np.asarray(ref), rtol=1e-3, atol=1e-3)

    print("KERNEL_OK")
</pallas_src>

<mosaic_0001>
module attributes {stable_mosaic.version = 11 : i64} {
  func.func @_kernel(%arg0: i32, %arg1: i32, %arg2: memref<17x16x16xbf16, #tpu.memory_space<vmem>>, %arg3: memref<16x1xf32, #tpu.memory_space<vmem>>, %arg4: memref<1x16x128xbf16, #tpu.memory_space<vmem>>, %arg5: memref<1x16x128xbf16, #tpu.memory_space<vmem>>, %arg6: memref<1x16x128xf32, #tpu.memory_space<vmem>>, %arg7: memref<16x256xbf16, #tpu.memory_space<vmem>>) attributes {dimension_semantics = [#tpu.dimension_semantics<parallel>, #tpu.dimension_semantics<parallel>], iteration_bounds = array<i64: 2, 1>, scalar_prefetch = 0 : i64, scratch_operands = 1 : i64, tpu.core_type = #tpu.core_type<tc>, window_params = [{pipeline_mode = #tpu.pipeline_mode<synchronous>, transform_indices = @transform_0, window_bounds = array<i64: 17, 16, 16>}, {pipeline_mode = #tpu.pipeline_mode<synchronous>, transform_indices = @transform_1, window_bounds = array<i64: 16, 1>}, {transform_indices = @transform_2, window_bounds = array<i64: 1, 16, 128>}, {transform_indices = @transform_3, window_bounds = array<i64: 1, 16, 128>}, {transform_indices = @transform_4, window_bounds = array<i64: 1, 16, 128>}]} {
    %c0 = arith.constant 0 : index
    %c0_0 = arith.constant 0 : index
    %c0_1 = arith.constant 0 : index
    %0 = vector.load %arg4[%c0, %c0_0, %c0_1] : memref<1x16x128xbf16, #tpu.memory_space<vmem>>, vector<1x16x128xbf16>
    %1 = vector.shape_cast %0 : vector<1x16x128xbf16> to vector<16x128xbf16>
    %c0_2 = arith.constant 0 : index
    %c0_3 = arith.constant 0 : index
    %2 = vector.load %arg7[%c0_2, %c0_3] : memref<16x256xbf16, #tpu.memory_space<vmem>>, vector<16x128xbf16>
    tpu.vector_store %arg7[%c0_2, %c0_3], %1 {strides = array<i32>} : memref<16x256xbf16, #tpu.memory_space<vmem>>, vector<16x128xbf16>,
    %c0_4 = arith.constant 0 : index
    %c0_5 = arith.constant 0 : index
    %c0_6 = arith.constant 0 : index
    %3 = vector.load %arg5[%c0_4, %c0_5, %c0_6] : memref<1x16x128xbf16, #tpu.memory_space<vmem>>, vector<1x16x128xbf16>
    %4 = vector.shape_cast %3 : vector<1x16x128xbf16> to vector<16x128xbf16>
    %c0_7 = arith.constant 0 : index
    %c128 = arith.constant 128 : index
    %5 = vector.load %arg7[%c0_7, %c128] : memref<16x256xbf16, #tpu.memory_space<vmem>>, vector<16x128xbf16>
    tpu.vector_store %arg7[%c0_7, %c128], %4 {strides = array<i32>} : memref<16x256xbf16, #tpu.memory_space<vmem>>, vector<16x128xbf16>,
    %c0_8 = arith.constant 0 : index
    %c0_9 = arith.constant 0 : index
    %c0_10 = arith.constant 0 : index
    %6 = vector.load %arg2[%c0_8, %c0_9, %c0_10] : memref<17x16x16xbf16, #tpu.memory_space<vmem>>, vector<1x16x16xbf16>
    %7 = vector.shape_cast %6 : vector<1x16x16xbf16> to vector<16x16xbf16>
    %c0_11 = arith.constant 0 : index
    %c0_12 = arith.constant 0 : index
    %8 = vector.load %arg7[%c0_11, %c0_12] : memref<16x256xbf16, #tpu.memory_space<vmem>>, vector<16x128xbf16>
    %cst = arith.constant dense<0.000000e+00> : vector<16x128xf32>
    %9 = tpu.matmul %7, %8, %cst {dimension_numbers = #tpu.dot_dimension_numbers<[1], [0], [0], [1], [0, 0, 1, 1], [], []>} : vector<16x16xbf16>, vector<16x128xbf16>, vector<16x128xf32> -> vector<16x128xf32>
    %c1 = arith.constant 1 : index
    %c0_13 = arith.constant 0 : index
    %c0_14 = arith.constant 0 : index
    %10 = vector.load %arg2[%c1, %c0_13, %c0_14] : memref<17x16x16xbf16, #tpu.memory_space<vmem>>, vector<1x16x16xbf16>
    %11 = vector.shape_cast %10 : vector<1x16x16xbf16> to vector<16x16xbf16>
    %c0_15 = arith.constant 0 : index
    %c1_16 = arith.constant 1 : index
    %12 = vector.load %arg7[%c0_15, %c1_16] : memref<16x256xbf16, #tpu.memory_space<vmem>>, vector<16x128xbf16>
    %cst_17 = arith.constant dense<0.000000e+00> : vector<16x128xf32>
    %13 = tpu.matmul %11, %12, %cst_17 {dimension_numbers = #tpu.dot_dimension_numbers<[1], [0], [0], [1], [0, 0, 1, 1], [], []>} : vector<16x16xbf16>, vector<16x128xbf16>, vector<16x128xf32> -> vector<16x128xf32>
    %14 = arith.addf %9, %13 : vector<16x128xf32>
    %c2 = arith.constant 2 : index
    %c0_18 = arith.constant 0 : index
    %c0_19 = arith.constant 0 : index
    %15 = vector.load %arg2[%c2, %c0_18, %c0_19] : memref<17x16x16xbf16, #tpu.memory_space<vmem>>, vector<1x16x16xbf16>
    %16 = vector.shape_cast %15 : vector<1x16x16xbf16> to vector<16x16xbf16>
    %c0_20 = arith.constant 0 : index
    %c2_21 = arith.constant 2 : index
    %17 = vector.load %arg7[%c0_20, %c2_21] : memref<16x256xbf16, #tpu.memory_space<vmem>>, vector<16x128xbf16>
    %cst_22 = arith.constant dense<0.000000e+00> : vector<16x128xf32>
    %18 = tpu.matmul %16, %17, %cst_22 {dimension_numbers = #tpu.dot_dimension_numbers<[1], [0], [0], [1], [0, 0, 1, 1], [], []>} : vector<16x16xbf16>, vector<16x128xbf16>, vector<16x128xf32> -> vector<16x128xf32>
    %19 = arith.addf %14, %18 : vector<16x128xf32>
    %c3 = arith.constant 3 : index
    %c0_23 = arith.constant 0 : index
    %c0_24 = arith.constant 0 : index
    %20 = vector.load %arg2[%c3, %c0_23, %c0_24] : memref<17x16x16xbf16, #tpu.memory_space<vmem>>, vector<1x16x16xbf16>
    %21 = vector.shape_cast %20 : vector<1x16x16xbf16> to vector<16x16xbf16>
    %c0_25 = arith.constant 0 : index
    %c3_26 = arith.constant 3 : index
    %22 = vector.load %arg7[%c0_25, %c3_26] : memref<16x256xbf16, #tpu.memory_space<vmem>>, vector<16x128xbf16>
    %cst_27 = arith.constant dense<0.000000e+00> : vector<16x128xf32>
    %23 = tpu.matmul %21, %22, %cst_27 {dimension_numbers = #tpu.dot_dimension_numbers<[1], [0], [0], [1], [0, 0, 1, 1], [], []>} : vector<16x16xbf16>, vector<16x128xbf16>, vector<16x128xf32> -> vector<16x128xf32>
    %24 = arith.addf %19, %23 : vector<16x128xf32>
    %c4 = arith.constant 4 : index
    %c0_28 = arith.constant 0 : index
    %c0_29 = arith.constant 0 : index
    %25 = vector.load %arg2[%c4, %c0_28, %c0_29] : memref<17x16x16xbf16, #tpu.memory_space<vmem>>, vector<1x16x16xbf16>
    %26 = vector.shape_cast %25 : vector<1x16x16xbf16> to vector<16x16xbf16>
    %c0_30 = arith.constant 0 : index
    %c4_31 = arith.constant 4 : index
    %27 = vector.load %arg7[%c0_30, %c4_31] : memref<16x256xbf16, #tpu.memory_space<vmem>>, vector<16x128xbf16>
    %cst_32 = arith.constant dense<0.000000e+00> : vector<16x128xf32>
    %28 = tpu.matmul %26, %27, %cst_32 {dimension_numbers = #tpu.dot_dimension_numbers<[1], [0], [0], [1], [0, 0, 1, 1], [], []>} : vector<16x16xbf16>, vector<16x128xbf16>, vector<16x128xf32> -> vector<16x128xf32>
    %29 = arith.addf %24, %28 : vector<16x128xf32>
    %c5 = arith.constant 5 : index
    %c0_33 = arith.constant 0 : index
    %c0_34 = arith.constant 0 : index
    %30 = vector.load %arg2[%c5, %c0_33, %c0_34] : memref<17x16x16xbf16, #tpu.memory_space<vmem>>, vector<1x16x16xbf16>
    %31 = vector.shape_cast %30 : vector<1x16x16xbf16> to vector<16x16xbf16>
    %c0_35 = arith.constant 0 : index
    %c5_36 = arith.constant 5 : index
    %32 = vector.load %arg7[%c0_35, %c5_36] : memref<16x256xbf16, #tpu.memory_space<vmem>>, vector<16x128xbf16>
    %cst_37 = arith.constant dense<0.000000e+00> : vector<16x128xf32>
    %33 = tpu.matmul %31, %32, %cst_37 {dimension_numbers = #tpu.dot_dimension_numbers<[1], [0], [0], [1], [0, 0, 1, 1], [], []>} : vector<16x16xbf16>, vector<16x128xbf16>, vector<16x128xf32> -> vector<16x128xf32>
    %34 = arith.addf %29, %33 : vector<16x128xf32>
    %c6 = arith.constant 6 : index
    %c0_38 = arith.constant 0 : index
    %c0_39 = arith.constant 0 : index
    %35 = vector.load %arg2[%c6, %c0_38, %c0_39] : memref<17x16x16xbf16, #tpu.memory_space<vmem>>, vector<1x16x16xbf16>
    %36 = vector.shape_cast %35 : vector<1x16x16xbf16> to vector<16x16xbf16>
    %c0_40 = arith.constant 0 : index
    %c6_41 = arith.constant 6 : index
    %37 = vector.load %arg7[%c0_40, %c6_41] : memref<16x256xbf16, #tpu.memory_space<vmem>>, vector<16x128xbf16>
    %cst_42 = arith.constant dense<0.000000e+00> : vector<16x128xf32>
    %38 = tpu.matmul %36, %37, %cst_42 {dimension_numbers = #tpu.dot_dimension_numbers<[1], [0], [0], [1], [0, 0, 1, 1], [], []>} : vector<16x16xbf16>, vector<16x128xbf16>, vector<16x128xf32> -> vector<16x128xf32>
    %39 = arith.addf %34, %38 : vector<16x128xf32>
    %c7 = arith.constant 7 : index
    %c0_43 = arith.constant 0 : index
    %c0_44 = arith.constant 0 : index
    %40 = vector.load %arg2[%c7, %c0_43, %c0_44] : memref<17x16x16xbf16, #tpu.memory_space<vmem>>, vector<1x16x16xbf16>
    %41 = vector.shape_cast %40 : vector<1x16x16xbf16> to vector<16x16xbf16>
    %c0_45 = arith.constant 0 : index
    %c7_46 = arith.constant 7 : index
    %42 = vector.load %arg7[%c0_45, %c7_46] : memref<16x256xbf16, #tpu.memory_space<vmem>>, vector<16x128xbf16>
    %cst_47 = arith.constant dense<0.000000e+00> : vector<16x128xf32>
    %43 = tpu.matmul %41, %42, %cst_47 {dimension_numbers = #tpu.dot_dimension_numbers<[1], [0], [0], [1], [0, 0, 1, 1], [], []>} : vector<16x16xbf16>, vector<16x128xbf16>, vector<16x128xf32> -> vector<16x128xf32>
    %44 = arith.addf %39, %43 : vector<16x128xf32>
    %c8 = arith.constant 8 : index
    %c0_48 = arith.constant 0 : index
    %c0_49 = arith.constant 0 : index
    %45 = vector.load %arg2[%c8, %c0_48, %c0_49] : memref<17x16x16xbf16, #tpu.memory_space<vmem>>, vector<1x16x16xbf16>
    %46 = vector.shape_cast %45 : vector<1x16x16xbf16> to vector<16x16xbf16>
    %c0_50 = arith.constant 0 : index
    %c8_51 = arith.constant 8 : index
    %47 = vector.load %arg7[%c0_50, %c8_51] : memref<16x256xbf16, #tpu.memory_space<vmem>>, vector<16x128xbf16>
    %cst_52 = arith.constant dense<0.000000e+00> : vector<16x128xf32>
    %48 = tpu.matmul %46, %47, %cst_52 {dimension_numbers = #tpu.dot_dimension_numbers<[1], [0], [0], [1], [0, 0, 1, 1], [], []>} : vector<16x16xbf16>, vector<16x128xbf16>, vector<16x128xf32> -> vector<16x128xf32>
    %49 = arith.addf %44, %48 : vector<16x128xf32>
    %c9 = arith.constant 9 : index
    %c0_53 = arith.constant 0 : index
    %c0_54 = arith.constant 0 : index
    %50 = vector.load %arg2[%c9, %c0_53, %c0_54] : memref<17x16x16xbf16, #tpu.memory_space<vmem>>, vector<1x16x16xbf16>
    %51 = vector.shape_cast %50 : vector<1x16x16xbf16> to vector<16x16xbf16>
    %c0_55 = arith.constant 0 : index
    %c9_56 = arith.constant 9 : index
    %52 = vector.load %arg7[%c0_55, %c9_56] : memref<16x256xbf16, #tpu.memory_space<vmem>>, vector<16x128xbf16>
    %cst_57 = arith.constant dense<0.000000e+00> : vector<16x128xf32>
    %53 = tpu.matmul %51, %52, %cst_57 {dimension_numbers = #tpu.dot_dimension_numbers<[1], [0], [0], [1], [0, 0, 1, 1], [], []>} : vector<16x16xbf16>, vector<16x128xbf16>, vector<16x128xf32> -> vector<16x128xf32>
    %54 = arith.addf %49, %53 : vector<16x128xf32>
    %c10 = arith.constant 10 : index
    %c0_58 = arith.constant 0 : index
    %c0_59 = arith.constant 0 : index
    %55 = vector.load %arg2[%c10, %c0_58, %c0_59] : memref<17x16x16xbf16, #tpu.memory_space<vmem>>, vector<1x16x16xbf16>
    %56 = vector.shape_cast %55 : vector<1x16x16xbf16> to vector<16x16xbf16>
    %c0_60 = arith.constant 0 : index
    %c10_61 = arith.constant 10 : index
    %57 = vector.load %arg7[%c0_60, %c10_61] : memref<16x256xbf16, #tpu.memory_space<vmem>>, vector<16x128xbf16>
    %cst_62 = arith.constant dense<0.000000e+00> : vector<16x128xf32>
    %58 = tpu.matmul %56, %57, %cst_62 {dimension_numbers = #tpu.dot_dimension_numbers<[1], [0], [0], [1], [0, 0, 1, 1], [], []>} : vector<16x16xbf16>, vector<16x128xbf16>, vector<16x128xf32> -> vector<16x128xf32>
    %59 = arith.addf %54, %58 : vector<16x128xf32>
    %c11 = arith.constant 11 : index
    %c0_63 = arith.constant 0 : index
    %c0_64 = arith.constant 0 : index
    %60 = vector.load %arg2[%c11, %c0_63, %c0_64] : memref<17x16x16xbf16, #tpu.memory_space<vmem>>, vector<1x16x16xbf16>
    %61 = vector.shape_cast %60 : vector<1x16x16xbf16> to vector<16x16xbf16>
    %c0_65 = arith.constant 0 : index
    %c11_66 = arith.constant 11 : index
    %62 = vector.load %arg7[%c0_65, %c11_66] : memref<16x256xbf16, #tpu.memory_space<vmem>>, vector<16x128xbf16>
    %cst_67 = arith.constant dense<0.000000e+00> : vector<16x128xf32>
    %63 = tpu.matmul %61, %62, %cst_67 {dimension_numbers = #tpu.dot_dimension_numbers<[1], [0], [0], [1], [0, 0, 1, 1], [], []>} : vector<16x16xbf16>, vector<16x128xbf16>, vector<16x128xf32> -> vector<16x128xf32>
    %64 = arith.addf %59, %63 : vector<16x128xf32>
    %c12 = arith.constant 12 : index
    %c0_68 = arith.constant 0 : index
    %c0_69 = arith.constant 0 : index
    %65 = vector.load %arg2[%c12, %c0_68, %c0_69] : memref<17x16x16xbf16, #tpu.memory_space<vmem>>, vector<1x16x16xbf16>
    %66 = vector.shape_cast %65 : vector<1x16x16xbf16> to vector<16x16xbf16>
    %c0_70 = arith.constant 0 : index
    %c12_71 = arith.constant 12 : index
    %67 = vector.load %arg7[%c0_70, %c12_71] : memref<16x256xbf16, #tpu.memory_space<vmem>>, vector<16x128xbf16>
    %cst_72 = arith.constant dense<0.000000e+00> : vector<16x128xf32>
    %68 = tpu.matmul %66, %67, %cst_72 {dimension_numbers = #tpu.dot_dimension_numbers<[1], [0], [0], [1], [0, 0, 1, 1], [], []>} : vector<16x16xbf16>, vector<16x128xbf16>, vector<16x128xf32> -> vector<16x128xf32>
    %69 = arith.addf %64, %68 : vector<16x128xf32>
    %c13 = arith.constant 13 : index
    %c0_73 = arith.constant 0 : index
    %c0_74 = arith.constant 0 : index
    %70 = vector.load %arg2[%c13, %c0_73, %c0_74] : memref<17x16x16xbf16, #tpu.memory_space<vmem>>, vector<1x16x16xbf16>
    %71 = vector.shape_cast %70 : vector<1x16x16xbf16> to vector<16x16xbf16>
    %c0_75 = arith.constant 0 : index
    %c13_76 = arith.constant 13 : index
    %72 = vector.load %arg7[%c0_75, %c13_76] : memref<16x256xbf16, #tpu.memory_space<vmem>>, vector<16x128xbf16>
    %cst_77 = arith.constant dense<0.000000e+00> : vector<16x128xf32>
    %73 = tpu.matmul %71, %72, %cst_77 {dimension_numbers = #tpu.dot_dimension_numbers<[1], [0], [0], [1], [0, 0, 1, 1], [], []>} : vector<16x16xbf16>, vector<16x128xbf16>, vector<16x128xf32> -> vector<16x128xf32>
    %74 = arith.addf %69, %73 : vector<16x128xf32>
    %c14 = arith.constant 14 : index
    %c0_78 = arith.constant 0 : index
    %c0_79 = arith.constant 0 : index
    %75 = vector.load %arg2[%c14, %c0_78, %c0_79] : memref<17x16x16xbf16, #tpu.memory_space<vmem>>, vector<1x16x16xbf16>
    %76 = vector.shape_cast %75 : vector<1x16x16xbf16> to vector<16x16xbf16>
    %c0_80 = arith.constant 0 : index
    %c14_81 = arith.constant 14 : index
    %77 = vector.load %arg7[%c0_80, %c14_81] : memref<16x256xbf16, #tpu.memory_space<vmem>>, vector<16x128xbf16>
    %cst_82 = arith.constant dense<0.000000e+00> : vector<16x128xf32>
    %78 = tpu.matmul %76, %77, %cst_82 {dimension_numbers = #tpu.dot_dimension_numbers<[1], [0], [0], [1], [0, 0, 1, 1], [], []>} : vector<16x16xbf16>, vector<16x128xbf16>, vector<16x128xf32> -> vector<16x128xf32>
    %79 = arith.addf %74, %78 : vector<16x128xf32>
    %c15 = arith.constant 15 : index
    %c0_83 = arith.constant 0 : index
    %c0_84 = arith.constant 0 : index
    %80 = vector.load %arg2[%c15, %c0_83, %c0_84] : memref<17x16x16xbf16, #tpu.memory_space<vmem>>, vector<1x16x16xbf16>
    %81 = vector.shape_cast %80 : vector<1x16x16xbf16> to vector<16x16xbf16>
    %c0_85 = arith.constant 0 : index
    %c15_86 = arith.constant 15 : index
    %82 = vector.load %arg7[%c0_85, %c15_86] : memref<16x256xbf16, #tpu.memory_space<vmem>>, vector<16x128xbf16>
    %cst_87 = arith.constant dense<0.000000e+00> : vector<16x128xf32>
    %83 = tpu.matmul %81, %82, %cst_87 {dimension_numbers = #tpu.dot_dimension_numbers<[1], [0], [0], [1], [0, 0, 1, 1], [], []>} : vector<16x16xbf16>, vector<16x128xbf16>, vector<16x128xf32> -> vector<16x128xf32>
    %84 = arith.addf %79, %83 : vector<16x128xf32>
    %c16 = arith.constant 16 : index
    %c0_88 = arith.constant 0 : index
    %c0_89 = arith.constant 0 : index
    %85 = vector.load %arg2[%c16, %c0_88, %c0_89] : memref<17x16x16xbf16, #tpu.memory_space<vmem>>, vector<1x16x16xbf16>
    %86 = vector.shape_cast %85 : vector<1x16x16xbf16> to vector<16x16xbf16>
    %c0_90 = arith.constant 0 : index
    %c16_91 = arith.constant 16 : index
    %87 = vector.load %arg7[%c0_90, %c16_91] : memref<16x256xbf16, #tpu.memory_space<vmem>>, vector<16x128xbf16>
    %cst_92 = arith.constant dense<0.000000e+00> : vector<16x128xf32>
    %88 = tpu.matmul %86, %87, %cst_92 {dimension_numbers = #tpu.dot_dimension_numbers<[1], [0], [0], [1], [0, 0, 1, 1], [], []>} : vector<16x16xbf16>, vector<16x128xbf16>, vector<16x128xf32> -> vector<16x128xf32>
    %89 = arith.addf %84, %88 : vector<16x128xf32>
    %c0_93 = arith.constant 0 : index
    %c0_94 = arith.constant 0 : index
    %90 = vector.load %arg3[%c0_93, %c0_94] : memref<16x1xf32, #tpu.memory_space<vmem>>, vector<16x1xf32>
    %91 = vector.broadcast %90 : vector<16x1xf32> to vector<16x128xf32>
    %92 = arith.addf %89, %91 : vector<16x128xf32>
    %c0_95 = arith.constant 0 : index
    %c0_96 = arith.constant 0 : index
    %c0_97 = arith.constant 0 : index
    %93 = vector.load %arg6[%c0_95, %c0_96, %c0_97] : memref<1x16x128xf32, #tpu.memory_space<vmem>>, vector<1x16x128xf32>
    %94 = vector.shape_cast %93 : vector<1x16x128xf32> to vector<16x128xf32>
    %95 = vector.shape_cast %92 : vector<16x128xf32> to vector<1x16x128xf32>
    tpu.vector_store %arg6[%c0_95, %c0_96, %c0_97], %95 {strides = array<i32>} : memref<1x16x128xf32, #tpu.memory_space<vmem>>, vector<1x16x128xf32>,
    return
  }
  func.func @transform_0(%arg0: i32, %arg1: i32) -> (i32, i32, i32) {
    %c0_i32 = arith.constant 0 : i32
    %c0_i32_0 = arith.constant 0 : i32
    %c0_i32_1 = arith.constant 0 : i32
    %c0_i32_2 = arith.constant 0 : i32
    return %c0_i32, %c0_i32_0, %c0_i32_1 : i32, i32, i32
  }
  func.func @transform_1(%arg0: i32, %arg1: i32) -> (i32, i32) {
    %c0_i32 = arith.constant 0 : i32
    %c0_i32_0 = arith.constant 0 : i32
    %c0_i32_1 = arith.constant 0 : i32
    return %c0_i32, %c0_i32_0 : i32, i32
  }
  func.func @transform_2(%arg0: i32, %arg1: i32) -> (i32, i32, i32) {
    %c0_i32 = arith.constant 0 : i32
    %c0_i32_0 = arith.constant 0 : i32
    return %arg0, %c0_i32, %arg1 : i32, i32, i32
  }
  func.func @transform_3(%arg0: i32, %arg1: i32) -> (i32, i32, i32) {
    %c1_i32 = arith.constant 1 : i32
    %0 = arith.addi %arg1, %c1_i32 : i32
    %c0_i32 = arith.constant 0 : i32
    %c0_i32_0 = arith.constant 0 : i32
    return %arg0, %c0_i32, %0 : i32, i32, i32
  }
  func.func @transform_4(%arg0: i32, %arg1: i32) -> (i32, i32, i32) {
    %c0_i32 = arith.constant 0 : i32
    %c0_i32_0 = arith.constant 0 : i32
    return %arg0, %c0_i32, %arg1 : i32, i32, i32
  }
}

</mosaic_0001>

<bundles_post_ra>
// kernel: tpu_custom_call.1
= control target key start
LH: loop header
LB: loop body
LE: loop exit
PB: predicated region body
PF: predicated region fallthrough
CT: control target
= control target key end

     0   :  { %s2485_s0 = inlined_call_operand.hbm [shape: bf16[17,16,16], index: 0, kind: input, shape index: {}]   ;;  %s2486_s1 = inlined_call_operand.hbm [shape: f32[16,1], index: 1, kind: input, shape index: {}]   ;;  %s2487_s2 = inlined_call_operand.hbm [shape: bf16[2,16,256], index: 2, kind: input, shape index: {}]   ;;  %s2488_s3 = inlined_call_operand.hbm [shape: bf16[2,16,256], index: 3, kind: input, shape index: {}]   ;;  %s2489_s4 = inlined_call_operand.hbm [shape: f32[2,16,128], index: 4, kind: output, shape index: {}]  }
   0x1   :  { %2505 = sst [smem:[#allocation18_spill]] %s2485_s0 }
   0x2   :  { %2506 = sst [smem:[#allocation19_spill]] %s2487_s2 }
   0x3   :  { %9 = vsyncpa [#allocation4], 0 }
   0x4   :  { %10 = vsyncpa [#allocation7], 0 }
   0x5   :  { %11 = vsyncpa [#allocation5], 0 }
   0x6   :  { %13 = vsyncpa [#allocation5 + $0x1], 0  ;;  %s2108_s15 = smov 0   ;;  %s2110_s16 = smov 0  }
   0x7   :  { %s2112_s17 = smov 0   ;;  %s2114_s18 = smov 0  }
   0x8   :  { %s2116_s19 = smov 0   ;;  %s2118_s20 = smov 0  }
   0x9 LB: > { %s2139_s21 = sadd.s32 4294967295, %s2051_s20   ;;  %s1513_s22 = sadd.s32 4294967294, %s2051_s20   ;;  %s2051_s20 = sphi %s2118_s20, %s19_s20   ;;  %s2047_s19 = sphi %s2116_s19, %s2544_s19   ;;  %s2043_s18 = sphi %s2114_s18, %s2543_s18   ;;  %s2039_s17 = sphi %s2112_s17, %s2542_s17   ;;  %s2035_s16 = sphi %s2110_s16, %s2541_s16   ;;  %s2031_s15 = sphi %s2108_s15, %s2540_s15  }
   0xa   : > { %s82_s23 = sadd.s32 1, %s2039_s17  ;;  %p89_p0 = scmp.ne.s32.totalorder %s2039_s17, %s2035_s16 }
   0xb   : > { %p90_p1 = scmp.eq.s32.totalorder %s2051_s20, 0  ;;  %p95_p2 = scmp.ne.s32.totalorder %s2035_s16, %s2031_s15 }
   0xc   : > { %p2490_p3 = scmp.eq.s32.totalorder %s2139_s21, 0  ;;  %p151_p4 = scmp.eq.s32.totalorder %s2139_s21, 1 }
   0xd   : > { %p2150_p5 = por %p90_p1, %p89_p0  ;;  %p157_p6 = scmp.eq.s32.totalorder %s1513_s22, 1 }
   0xe   : > { %p2156_p7 = por %p2490_p3, %p95_p2  ;;  %p2160_p8 = por %p151_p4, %p89_p0 }
   0xf   : > { %p2164_p9 = por %p157_p6, %p95_p2  ;;  %p1514_p10 = scmp.ge.s32.totalorder %s2051_s20, 1 }
  0x10   : > { %s2508_s25 = scalar_select %p2156_p7, 1, 0 }
  0x11   : > { %s2509_s26 = scalar_select %p2160_p8, 1, 0 }
  0x12   : > { %s2510_s27 = scalar_select %p2164_p9, 1, 0 }
  0x13   : > { %p164_p11 = scmp.lt.s32.totalorder %s2051_s20, 3  ;;  %s2053_s29 = smov [#allocation3]  }
  0x14   : > { %2511 = sst [smem:[#allocation15_spill]] %s2510_s27  ;;  %s176_s30 = sshll.u32 %s2053_s29, 4  ;;  %s2174_s30 = int_to_ptr.vmem [resolvable:$true] %s176_s30 }
  0x15   : > { %p2170_p12 = pnand %p1514_p10, %p164_p11  ;;  %p1744_p1 = scmp.lt.s32.totalorder %s2051_s20, 2 }
  0x16   : > { %s31_s7 = sadd.s32 1, %s2047_s19  ;;  %s2516_s0 = sld [smem:[#allocation18_spill]] }
  0x17   : > { %s2512_s28 = scalar_select %p2170_p12, 1, 0 }
  0x18   : > { %p1724_p13 = pneg %p2170_p12  ;;  %p2188_p4 = pnand %p1744_p1, %p2150_p5 }
  0x19   : > { %p2193_p6 = scmp.ge.s32.totalorder %s31_s7, 2 }
  0x1a   : > { %p2182_p2 = pnand %p1724_p13, %p2490_p3 }
  0x1b   : > { %s2514_s6 = scalar_select %p2188_p4, 1, 0 }
  0x1c   : > { %s1844_s11 = scalar_lea.hbm %s2516_s0, 2176  ;;  %p2500_p11 = pneg %p2182_p2 }
  0x1d   : > { %p1845_p10 = scmp.ne.s32.totalorder %s2516_s0, %s1844_s11  ;;  %p1851_p1 = scmp.lt.u32.totalorder %s1844_s11, %s2516_s0 }
  0x1f   : > { %p1847_p5 = pnand %p2500_p11, %p1845_p10 }
  0x21   : > { %p1848_p13 = pneg %p1847_p5 }
  0x23   : > { %p1853_p0 = pnand %p1851_p1, %p1848_p13 }
  0x25   : > { %1856 = shalt.err (!%p1853_p0)
}
  0x26   : > { %s1857_s24 = scalar_lea.vmem %s2174_s30, 2176  ;;  %p1865_p7 = scmp.lt.s32.totalorder %s2174_s30, %s2174_s30 }
  0x27   : > { %p1858_p3 = scmp.ne.s32.totalorder %s2174_s30, %s1857_s24  ;;  %p1866_p10 = scmp.lt.s32.totalorder %s1857_s24, %s1857_s24 }
  0x29   : > { %p1860_p9 = pnand %p1858_p3, %p2500_p11  ;;  %p1867_p5 = por %p1866_p10, %p1865_p7 }
  0x2b   : > { %p1861_p8 = pneg %p1860_p9 }
  0x2d   : > { %p1868_p12 = pnand %p1867_p5, %p1861_p8 }
  0x2f   : > { %1871 = shalt.err (!%p1868_p12)
}
  0x30   : > { %s2495_s29 = smov 64   ;;  %s2498_s9 = smov 4  }
  0x31   : > { %1727 = dma.hbm_to_vmem [thread:$0]  (!%p2182_p2), %s2516_s0, 2176, %s2174_s30, [#allocation4], %s2495_s29, %s2495_s29, %s2498_s9  }
  0x32   : > { %s2546_s7 = smov (%p2193_p6, %s31_s7), 0  ;;  %s203_s12 = sand.u32 1, %s2051_s20  }
  0x33   : > { %2517 = sst [smem:[#allocation16_spill]] %s2546_s7  ;;  %s205_s13 = sand.u32 1, %s2039_s17  }
  0x34   : > { %s77_s14 = ssub.s32 %s2047_s19, %s2546_s7  ;;  %s2235_s22 = sshll.u32 %s205_s13, 3 }
  0x35   : > { %p80_p3 = scmp.eq.s32.totalorder %s77_s14, 0  ;;  %s2497_s24 = sshll.u32 %s2047_s19, 8 }
  0x36   : > { %s2519_s2 = sld [smem:[#allocation19_spill]]  ;;  %s207_s11 = scalar_lea.vmem [#allocation8], %s2235_s22 }
  0x37   : > { %s2241_s27 = scalar_select %p80_p3, %s2039_s17, %s82_s23  }
  0x38   : > { %s215_s29 = sshll.u32 %s207_s11, 4  ;;  %s2253_s13 = scalar_lea.sflag [#allocation4], %s203_s12  ;;  %s2251_s29 = int_to_ptr.vmem [resolvable:$true] %s215_s29 }
  0x39   : > { %2518 = sst [smem:[#allocation17_spill]] %s2241_s27  ;;  %p2502_p8 = pneg %p2188_p4 }
  0x3c   : > { %s2248_s8 = scalar_lea.hbm %s2519_s2, %s2497_s24  ;;  %s1877_s30 = scalar_lea.hbm %s2519_s2, 512 }
  0x3d   : > { %s1872_s14 = scalar_lea.hbm %s2248_s8, 128  ;;  %p1878_p0 = scmp.lt.u32.totalorder %s2248_s8, %s2519_s2 }
  0x3e   : > { %p1873_p7 = scmp.ne.s32.totalorder %s2248_s8, %s1872_s14  ;;  %p1879_p6 = scmp.lt.u32.totalorder %s1877_s30, %s1872_s14 }
  0x3f   : > { %p1881_p1 = scmp.lt.u32.totalorder %s1872_s14, %s2248_s8 }
  0x40   : > { %p1875_p9 = pnand %p2502_p8, %p1873_p7  ;;  %p1880_p13 = por %p1879_p6, %p1878_p0 }
  0x42   : > { %p1876_p12 = pneg %p1875_p9  ;;  %p1882_p10 = por %p1881_p1, %p1880_p13 }
  0x44   : > { %p1883_p5 = pnand %p1882_p10, %p1876_p12 }
  0x46   : > { %1886 = shalt.err (!%p1883_p5)
}
  0x47   : > { %s1887_s12 = scalar_lea.vmem %s2251_s29, 128  ;;  %s2056_s11 = smov [#allocation8]  }
  0x48   : > { %p1888_p3 = scmp.ne.s32.totalorder %s2251_s29, %s1887_s12  ;;  %s1892_s23 = sshll.u32 %s2056_s11, 4  ;;  %s1893_s23 = int_to_ptr.vmem [resolvable:$false] %s1892_s23 }
  0x49   : > { %s1894_s9 = scalar_lea.vmem %s1893_s23, 256  ;;  %p1895_p11 = scmp.lt.s32.totalorder %s2251_s29, %s1893_s23 }
  0x4a   : > { %p1890_p7 = pnand %p1888_p3, %p2502_p8  ;;  %p1896_p0 = scmp.lt.s32.totalorder %s1894_s9, %s1887_s12 }
  0x4c   : > { %p1891_p9 = pneg %p1890_p7  ;;  %p1897_p6 = por %p1896_p0, %p1895_p11 }
  0x4e   : > { %p1898_p13 = pnand %p1897_p6, %p1891_p9 }
  0x50   : > { %1901 = shalt.err (!%p1898_p13)
}
  0x51   : > { %s2057_s24 = smov 128   ;;  %s2520_s14 = smov 4  }
  0x52   : > { %s2521_s10 = smov 64   ;;  %s2058_s30 = smov [#allocation6]  }
  0x53   : > { %1734 = dma.hbm_to_vmem [thread:$0]  (!%p2188_p4), %s2248_s8, 128, %s2251_s29, %s2253_s13, %s2057_s24, %s2521_s10, %s2520_s14  }
  0x54   : > { %s189_s11 = sshll.u32 %s2058_s30, 4  ;;  %s1902_s12 = scalar_lea.hbm %s2486_s1, 256  ;;  %s190_s11 = int_to_ptr.vmem [resolvable:$true] %s189_s11 }
  0x55   : > { %p1903_p11 = scmp.ne.s32.totalorder %s2486_s1, %s1902_s12  ;;  %p2522_p12 = pneg %p2182_p2 }
  0x56   : > { %p1909_p5 = scmp.lt.u32.totalorder %s1902_s12, %s2486_s1 }
  0x57   : > { %p1905_p1 = pnand %p1903_p11, %p2522_p12 }
  0x59   : > { %p1906_p10 = pneg %p1905_p1 }
  0x5b   : > { %p1911_p3 = pnand %p1909_p5, %p1906_p10 }
  0x5d   : > { %1914 = shalt.err (!%p1911_p3)
}
  0x5e   : > { %s1915_s29 = scalar_lea.vmem %s190_s11, 256  ;;  %p2523_p9 = pmov %p2522_p12 }
  0x5f   : > { %p1916_p7 = scmp.ne.s32.totalorder %s190_s11, %s1915_s29  ;;  %p1923_p13 = scmp.lt.s32.totalorder %s190_s11, %s190_s11 }
  0x60   : > { %p1924_p8 = scmp.lt.s32.totalorder %s1915_s29, %s1915_s29 }
  0x61   : > { %p1918_p0 = pnand %p1916_p7, %p2523_p9 }
  0x62   : > { %p1925_p4 = por %p1924_p8, %p1923_p13 }
  0x63   : > { %p1919_p6 = pneg %p1918_p0 }
  0x65   : > { %p1926_p11 = pnand %p1925_p4, %p1919_p6 }
  0x67   : > { %1929 = shalt.err (!%p1926_p11)
}
  0x68   : > { %s2059_s0 = smov 8   ;;  %s2524_s7 = sshll.u32 %s2047_s19, 8 }
  0x69   : > { %1730 = dma.hbm_to_vmem [thread:$0]  (!%p2182_p2), %s2486_s1, 256, %s190_s11, [#allocation7], %s2057_s24, %s2057_s24, %s2059_s0  }
  0x6a   : > { %s1426_s23 = scalar_lea.hbm %s2488_s3, %s2524_s7  ;;  %s229_s12 = scalar_lea.vmem [#allocation9], %s2235_s22 }
  0x6b   : > { %s238_s9 = sshll.u32 %s229_s12, 4  ;;  %s2312_s29 = scalar_lea.hbm %s1426_s23, 64  ;;  %s2314_s9 = int_to_ptr.vmem [resolvable:$true] %s238_s9 }
  0x6c   : > { %s1960_s5 = scalar_lea.hbm %s1426_s23, 192  ;;  %p2525_p8 = scmp.ne.s32.totalorder %s2514_s6, 0 }
  0x6d   : > { %p1931_p4 = scmp.ne.s32.totalorder %s2312_s29, %s1960_s5  ;;  %s1935_s2 = scalar_lea.hbm %s2488_s3, 512 }
  0x6e   : > { %p2526_p12 = pneg %p2525_p8  ;;  %p1936_p10 = scmp.lt.u32.totalorder %s2312_s29, %s2488_s3 }
  0x6f   : > { %p1937_p5 = scmp.lt.u32.totalorder %s1935_s2, %s1960_s5  ;;  %p1939_p7 = scmp.lt.u32.totalorder %s1960_s5, %s2312_s29 }
  0x70   : > { %p1933_p1 = pnand %p1931_p4, %p2526_p12 }
  0x71   : > { %p1938_p3 = por %p1937_p5, %p1936_p10 }
  0x72   : > { %p1934_p2 = pneg %p1933_p1 }
  0x73   : > { %p1940_p9 = por %p1939_p7, %p1938_p3 }
  0x75   : > { %p1941_p0 = pnand %p1940_p9, %p1934_p2 }
  0x77   : > { %1944 = shalt.err (!%p1941_p0)
}
  0x78   : > { %s1945_s7 = scalar_lea.vmem %s2314_s9, 128  ;;  %p2527_p13 = pmov %p2526_p12 }
  0x79   : > { %p1946_p6 = scmp.ne.s32.totalorder %s2314_s9, %s1945_s7  ;;  %s2060_s8 = smov [#allocation9]  }
  0x7a   : > { %s1950_s30 = sshll.u32 %s2060_s8, 4  ;;  %s1951_s30 = int_to_ptr.vmem [resolvable:$false] %s1950_s30 }
  0x7b   : > { %p1948_p11 = pnand %p1946_p6, %p2527_p13  ;;  %s1952_s23 = scalar_lea.vmem %s1951_s30, 256 }
  0x7c   : > { %p1953_p12 = scmp.lt.s32.totalorder %s2314_s9, %s1951_s30  ;;  %p1954_p1 = scmp.lt.s32.totalorder %s1952_s23, %s1945_s7 }
  0x7d   : > { %p1949_p4 = pneg %p1948_p11 }
  0x7e   : > { %p1955_p10 = por %p1954_p1, %p1953_p12 }
  0x80   : > { %p1956_p5 = pnand %p1955_p10, %p1949_p4 }
  0x82   : > { %1959 = shalt.err (!%p1956_p5)
}
  0x83   : > { %1737 = dma.hbm_to_vmem [thread:$0]  (!%p2525_p8), %s2312_s29, 128, %s2314_s9, %s2253_s13, %s2057_s24, %s2521_s10, %s2520_s14  }
  0x84   : > { %p2528_p2 = scmp.ne.s32.totalorder %s2512_s28, 0 }
  0x85   : > { %p2529_p3 = scmp.eq.s32.totalorder (!%p2528_p2), %s2139_s21, 0 }
  0x86   : > { %250 = sbr.rel (%p2528_p2) target bundleno = 573 (0x23d), region = 36 }
  0x8d   : > { %2014 = dma.done.wait (%p2529_p3), [#allocation4], 2176   ;;  %p2530_p7 = pmov %p2529_p3 }
  0x8e   : > { %p2531_p9 = pmov %p2529_p3 }
  0x8f   : > { %2016 = vsyncadd (%p2530_p7), [#allocation4], 4294965120 }
  0x90   : > { %2018 = dma.done.wait (%p2531_p9), [#allocation7], 256   ;;  %p2532_p0 = pmov %p2529_p3 }
  0x91   : > { %s260_s6 = sand.u32 1, %s2139_s21   ;;  %s2354_s13 = sand.u32 1, %s2035_s16  }
  0x92   : > { %2020 = vsyncadd (%p2532_p0), [#allocation7], 4294967040  ;;  %s1527_s28 = sshll.u32 %s2354_s13, 3  ;;  %s261_s24 = scalar_lea.sflag [#allocation4], %s260_s6 }
  0x93   : > { %s264_s14 = scalar_lea.vmem [#allocation8], %s1527_s28  ;;  %p2533_p8 = scmp.ne.s32.totalorder %s2508_s25, 0 }
  0x95   : > { %2022 = dma.done.wait (%p2533_p8), %s261_s24, 256  }
  0x96   : > { %2024 = vsyncadd (%p2533_p8), %s261_s24, 4294967040  ;;  %v2061_v0 = vmov 0.0   ;;  %vm2062_vm0 = vmmov 0   ;;  %v1825_v1 = vld [vmem:[%s264_s14] sm:$0xff]   ;;  %s273_s21 = scalar_lea.vmem [#allocation9], %s1527_s28  ;;  %s2063_s10 = smov 126  }
  0x97   : > { %1608 = vmatprep.subr.bf16.mxu0 %v2061_v0  ;;  %1614 = vmatprep.subr.bf16.mxu1 %v2061_v0  ;;  %s2064_s12 = smov 127   ;;  %v1826_v2 = vld [vmem:[%s273_s21] sm:$0xff]   ;;  %v1828_v3 = vld [vmem:[#allocation3] sm:$0xff]   ;;  %vm345_vm1 = vcmask 130048   ;;  %s2065_s25 = smov 125   ;;  %v2079_v4 = vmov 0  }
  0x98   : > { %1610 = vmatprep.mubr.msk.bf16.mxu0 %vm2062_vm0, %v2061_v0  ;;  %1616 = vmatprep.mubr.msk.bf16.mxu1 %vm2062_vm0, %v2061_v0  ;;  %s2066_s9 = smov 124   ;;  %s2067_s29 = smov 123   ;;  %v1354_v5 = vld [vmem:[#allocation6] sm:$0xff]  ;;  %v1355_v6 = vld [vmem:[#allocation6 + $0x8] sm:$0xff]  ;;  %vm342_vm2 = vcmask 1039360   ;;  %vm451_vm3 = vcmask 1031168  }
  0x99   : > { %447 = vrot.lane.b32.xlu1 %v1825_v1, %s2063_s10  ;;  %338 = vrot.lane.b32.xlu0 %v1825_v1, %s2064_s12  ;;  %s2068_s5 = smov 122   ;;  %s2069_s11 = smov 121   ;;  %v1827_v12 = vld [vmem:[#allocation3 + $0x8] sm:$0xff]   ;;  %vm512_vm4 = vcmask 1022976   ;;  %v1830_v17 = vld [vmem:[#allocation3 + $0x18] sm:$0xff]   ;;  %vm573_vm5 = vcmask 1014784  }
  0x9a   : > { %1615 = vmatpush3.bf16.msra.mxu1 %v1825_v1  ;;  %s2070_s0 = smov 120   ;;  %s2071_s2 = smov 119   ;;  %1823 = vset.pattern.permute.xlu0 %v2079_v4  ;;  %v1829_v20 = vld [vmem:[#allocation3 + $0x10] sm:$0xff]   ;;  %vm634_vm6 = vcmask 1006592   ;;  %v1832_v25 = vld [vmem:[#allocation3 + $0x28] sm:$0xff]   ;;  %vm695_vm7 = vcmask 998400  }
  0x9b   : > { %1626 = vmatprep.subr.bf16.mxu1 %v2061_v0  ;;  %s2072_s27 = smov 118   ;;  %s2073_s22 = smov 117   ;;  %1824 = vset.pattern.permute.xlu1 %v2079_v4  ;;  %v1831_v28 = vld [vmem:[#allocation3 + $0x20] sm:$0xff]   ;;  %vm756_vm8 = vcmask 990208   ;;  %v1834_v33 = vld [vmem:[#allocation3 + $0x38] sm:$0xff]   ;;  %vm817_vm9 = vcmask 982016  }
  0x9c   : > { %s2074_s7 = smov 116   ;;  %s2075_s8 = smov 115   ;;  %v1833_v36 = vld [vmem:[#allocation3 + $0x30] sm:$0xff]   ;;  %vm878_vm10 = vcmask 973824   ;;  %v1836_v41 = vld [vmem:[#allocation3 + $0x48] sm:$0xff]   ;;  %vm939_vm11 = vcmask 965632  }
  0x9d   : > { %449 = vrot.lane.b32.xlu1 %v1826_v2, %s2063_s10  ;;  %340 = vrot.lane.b32.xlu0 %v1826_v2, %s2064_s12  ;;  %s2076_s30 = smov 114   ;;  %s2077_s23 = smov 113   ;;  %v1835_v44 = vld [vmem:[#allocation3 + $0x40] sm:$0xff]   ;;  %vm1000_vm12 = vcmask 957440   ;;  %v1838_v49 = vld [vmem:[#allocation3 + $0x58] sm:$0xff]   ;;  %vm1061_vm13 = vcmask 949248  }
  0x9e   : > { %1617 = vmatmul.mubr.msk.bf16.vlgmr.msra.gmra.mrb[0].mxu1 %vm345_vm1, %v1828_v3  ;;  %s2078_s6 = smov 112   ;;  %v1837_v52 = vld [vmem:[#allocation3 + $0x50] sm:$0xff]   ;;  %vm1122_vm14 = vcmask 941056   ;;  %v1840_v57 = vld [vmem:[#allocation3 + $0x68] sm:$0xff]   ;;  %vm1183_vm15 = vcmask 932864   ;;  %v1839_v60 = vld [vmem:[#allocation3 + $0x60] sm:$0xff]  }
  0x9f   : > { %1628 = vmatprep.mubr.msk.bf16.mxu1 %vm2062_vm0, %v2061_v0  ;;  %s1529_s28 = sshll.u32 %s2354_s13, 4  ;;  %s1573_s21 = sshll.u32 %s2043_s18, 8 }
  0xa0   : > { %s302_s24 = scalar_lea.vmem [#allocation10], %s1529_s28  ;;  %p2534_p13 = scmp.ne.s32.totalorder %s2509_s26, 0 }
  0xa1   : > { %510 = vrot.lane.b32.xlu1 %v1826_v2, %s2065_s25  ;;  %508 = vrot.lane.b32.xlu0 %v1825_v1, %s2065_s25  ;;  %s1385_s14 = sshll.u32 %s302_s24, 4  ;;  %s2436_s25 = scalar_lea.hbm %s2489_s4, %s1573_s21  ;;  %s2431_s14 = int_to_ptr.vmem [resolvable:$true] %s1385_s14 }
  0xa2   : > { %s1961_s18 = scalar_lea.vmem %s2431_s14, 256 }
  0xa3   : > { %p1962_p6 = scmp.ne.s32.totalorder %s2431_s14, %s1961_s18 }
  0xa5   : > { %571 = vrot.lane.b32.xlu1 %v1826_v2, %s2066_s9  ;;  %569 = vrot.lane.b32.xlu0 %v1825_v1, %s2066_s9  ;;  %s1371_s9 = scalar_lea.sflag [#allocation5], %s2354_s13  ;;  %p1963_p11 = pnand %p1962_p6, %p2534_p13 }
  0xa7   : > { %p1964_p4 = pneg %p1963_p11 }
  0xa9   : > { %632 = vrot.lane.b32.xlu1 %v1826_v2, %s2067_s29  ;;  %630 = vrot.lane.b32.xlu0 %v1825_v1, %s2067_s29  ;;  %s2080_s29 = smov [#allocation10]  }
  0xad   : > { %693 = vrot.lane.b32.xlu1 %v1826_v2, %s2068_s5  ;;  %691 = vrot.lane.b32.xlu0 %v1825_v1, %s2068_s5  ;;  %s1965_s5 = sshll.u32 %s2080_s29, 4  ;;  %s1966_s5 = int_to_ptr.vmem [resolvable:$false] %s1965_s5 }
  0xae   : > { %p1968_p12 = scmp.lt.s32.totalorder %s2431_s14, %s1966_s5 }
  0xb1   : > { %754 = vrot.lane.b32.xlu1 %v1826_v2, %s2069_s11  ;;  %752 = vrot.lane.b32.xlu0 %v1825_v1, %s2069_s11  ;;  %s1967_s11 = scalar_lea.vmem %s1966_s5, 512 }
  0xb2   : > { %p1969_p1 = scmp.lt.s32.totalorder %s1967_s11, %s1961_s18 }
  0xb4   : > { %p1970_p10 = por %p1969_p1, %p1968_p12 }
  0xb5   : > { %815 = vrot.lane.b32.xlu1 %v1826_v2, %s2070_s0  ;;  %813 = vrot.lane.b32.xlu0 %v1825_v1, %s2070_s0 }
  0xb6   : > { %p1971_p5 = pnand %p1970_p10, %p1964_p4 }
  0xb9   : > { %876 = vrot.lane.b32.xlu1 %v1826_v2, %s2071_s2  ;;  %874 = vrot.lane.b32.xlu0 %v1825_v1, %s2071_s2 }
  0xbd   : > { %937 = vrot.lane.b32.xlu1 %v1826_v2, %s2072_s27  ;;  %935 = vrot.lane.b32.xlu0 %v1825_v1, %s2072_s27 }
  0xc1   : > { %998 = vrot.lane.b32.xlu1 %v1826_v2, %s2073_s22  ;;  %996 = vrot.lane.b32.xlu0 %v1825_v1, %s2073_s22 }
  0xc5   : > { %1059 = vrot.lane.b32.xlu1 %v1826_v2, %s2074_s7  ;;  %1057 = vrot.lane.b32.xlu0 %v1825_v1, %s2074_s7 }
  0xc9   : > { %1120 = vrot.lane.b32.xlu1 %v1826_v2, %s2075_s8  ;;  %1118 = vrot.lane.b32.xlu0 %v1825_v1, %s2075_s8 }
  0xcd   : > { %1181 = vrot.lane.b32.xlu1 %v1826_v2, %s2076_s30  ;;  %1179 = vrot.lane.b32.xlu0 %v1825_v1, %s2076_s30 }
  0xd1   : > { %1242 = vrot.lane.b32.xlu1 %v1826_v2, %s2077_s23  ;;  %1240 = vrot.lane.b32.xlu0 %v1825_v1, %s2077_s23 }
  0xd5   : > { %1303 = vrot.lane.b32.xlu1 %v1826_v2, %s2078_s6  ;;  %1301 = vrot.lane.b32.xlu0 %v1825_v1, %s2078_s6  ;;  %v1842_v2 = vld [vmem:[#allocation3 + $0x78] sm:$0xff]  }
  0xd9   : > { %1358 = vperm.xlu0 %1823, %v1354_v5   ;;  %1363 = vperm.xlu1 %1824, %v1355_v6   ;;  %v1841_v5 = vld [vmem:[#allocation3 + $0x70] sm:$0xff]  }
 0x10b   : > { %v448_v7 = vpop.permute.xlu1 %447  ;;  %v339_v8 = vpop.permute.xlu0 %338 }
 0x10f   : > { %v450_v9 = vpop.permute.xlu1 %449  ;;  %v341_v10 = vpop.permute.xlu0 %340 }
 0x110   : > { %v343_v11 = vsel %vm342_vm2, %v339_v8, %v341_v10  ;;  %v452_v13 = vsel %vm451_vm3, %v448_v7, %v450_v9  ;;  %vm1244_vm2 = vcmask 924672   ;;  %vm1305_vm3 = vcmask 916480   ;;  %v1843_v7 = vld [vmem:[#allocation3 + $0x80] sm:$0xff]  }
 0x111   : > { %1609 = vmatpush3.bf16.msra.mxu0 %v343_v11 }
 0x112   : > { %1620 = vmatprep.subr.bf16.mxu0 %v2061_v0 }
 0x113   : > { %v511_v14 = vpop.permute.xlu1 %510  ;;  %v509_v15 = vpop.permute.xlu0 %508 }
 0x114   : > { %1611 = vmatmul.mubr.msk.bf16.vlgmr.msra.gmra.mrb[0].mxu0 %vm345_vm1, %v1827_v12  ;;  %v513_v16 = vsel %vm512_vm4, %v509_v15, %v511_v14 }
 0x115   : > { %1621 = vmatpush3.bf16.msra.mxu0 %v452_v13  ;;  %1627 = vmatpush3.bf16.msra.mxu1 %v513_v16 }
 0x116   : > { %1622 = vmatprep.mubr.msk.bf16.mxu0 %vm2062_vm0, %v2061_v0  ;;  %1632 = vmatprep.subr.bf16.mxu0 %v2061_v0 }
 0x117   : > { %v572_v18 = vpop.permute.xlu1 %571  ;;  %v570_v19 = vpop.permute.xlu0 %569  ;;  %1638 = vmatprep.subr.bf16.mxu1 %v2061_v0 }
 0x118   : > { %1629 = vmatmul.mubr.msk.bf16.vlgmr.msra.gmra.mrb[4].mxu1 %vm345_vm1, %v1830_v17  ;;  %v574_v21 = vsel %vm573_vm5, %v570_v19, %v572_v18 }
 0x119   : > { %1640 = vmatprep.mubr.msk.bf16.mxu1 %vm2062_vm0, %v2061_v0 }
 0x11b   : > { %v633_v22 = vpop.permute.xlu1 %632  ;;  %v631_v23 = vpop.permute.xlu0 %630 }
 0x11c   : > { %1623 = vmatmul.mubr.msk.bf16.vlgmr.msra.gmra.mrb[4].mxu0 %vm345_vm1, %v1829_v20  ;;  %v635_v24 = vsel %vm634_vm6, %v631_v23, %v633_v22 }
 0x11d   : > { %1633 = vmatpush3.bf16.msra.mxu0 %v574_v21  ;;  %1639 = vmatpush3.bf16.msra.mxu1 %v635_v24 }
 0x11e   : > { %1634 = vmatprep.mubr.msk.bf16.mxu0 %vm2062_vm0, %v2061_v0  ;;  %1644 = vmatprep.subr.bf16.mxu0 %v2061_v0 }
 0x11f   : > { %v694_v26 = vpop.permute.xlu1 %693  ;;  %v692_v27 = vpop.permute.xlu0 %691  ;;  %1650 = vmatprep.subr.bf16.mxu1 %v2061_v0 }
 0x120   : > { %1641 = vmatmul.mubr.msk.bf16.vlgmr.msra.gmra.mrb[8].mxu1 %vm345_vm1, %v1832_v25  ;;  %v696_v29 = vsel %vm695_vm7, %v692_v27, %v694_v26 }
 0x121   : > { %1652 = vmatprep.mubr.msk.bf16.mxu1 %vm2062_vm0, %v2061_v0 }
 0x123   : > { %v755_v30 = vpop.permute.xlu1 %754  ;;  %v753_v31 = vpop.permute.xlu0 %752 }
 0x124   : > { %1635 = vmatmul.mubr.msk.bf16.vlgmr.msra.gmra.mrb[8].mxu0 %vm345_vm1, %v1831_v28  ;;  %v757_v32 = vsel %vm756_vm8, %v753_v31, %v755_v30 }
 0x125   : > { %1645 = vmatpush3.bf16.msra.mxu0 %v696_v29  ;;  %1651 = vmatpush3.bf16.msra.mxu1 %v757_v32 }
 0x126   : > { %1646 = vmatprep.mubr.msk.bf16.mxu0 %vm2062_vm0, %v2061_v0  ;;  %1656 = vmatprep.subr.bf16.mxu0 %v2061_v0 }
 0x127   : > { %v816_v34 = vpop.permute.xlu1 %815  ;;  %v814_v35 = vpop.permute.xlu0 %813  ;;  %1662 = vmatprep.subr.bf16.mxu1 %v2061_v0 }
 0x128   : > { %1653 = vmatmul.mubr.msk.bf16.vlgmr.msra.gmra.mrb[12].mxu1 %vm345_vm1, %v1834_v33  ;;  %v818_v37 = vsel %vm817_vm9, %v814_v35, %v816_v34 }
 0x129   : > { %1664 = vmatprep.mubr.msk.bf16.mxu1 %vm2062_vm0, %v2061_v0 }
 0x12b   : > { %v877_v38 = vpop.permute.xlu1 %876  ;;  %v875_v39 = vpop.permute.xlu0 %874 }
 0x12c   : > { %1647 = vmatmul.mubr.msk.bf16.vlgmr.msra.gmra.mrb[12].mxu0 %vm345_vm1, %v1833_v36  ;;  %v879_v40 = vsel %vm878_vm10, %v875_v39, %v877_v38 }
 0x12d   : > { %1657 = vmatpush3.bf16.msra.mxu0 %v818_v37  ;;  %1663 = vmatpush3.bf16.msra.mxu1 %v879_v40 }
 0x12e   : > { %1658 = vmatprep.mubr.msk.bf16.mxu0 %vm2062_vm0, %v2061_v0  ;;  %1668 = vmatprep.subr.bf16.mxu0 %v2061_v0 }
 0x12f   : > { %v938_v42 = vpop.permute.xlu1 %937  ;;  %v936_v43 = vpop.permute.xlu0 %935  ;;  %1674 = vmatprep.subr.bf16.mxu1 %v2061_v0 }
 0x130   : > { %1665 = vmatmul.mubr.msk.bf16.vlgmr.msra.gmra.mrb[16].mxu1 %vm345_vm1, %v1836_v41  ;;  %v940_v45 = vsel %vm939_vm11, %v936_v43, %v938_v42 }
 0x131   : > { %1676 = vmatprep.mubr.msk.bf16.mxu1 %vm2062_vm0, %v2061_v0 }
 0x133   : > { %v999_v46 = vpop.permute.xlu1 %998  ;;  %v997_v47 = vpop.permute.xlu0 %996 }
 0x134   : > { %1659 = vmatmul.mubr.msk.bf16.vlgmr.msra.gmra.mrb[16].mxu0 %vm345_vm1, %v1835_v44  ;;  %v1001_v48 = vsel %vm1000_vm12, %v997_v47, %v999_v46 }
 0x135   : > { %1669 = vmatpush3.bf16.msra.mxu0 %v940_v45  ;;  %1675 = vmatpush3.bf16.msra.mxu1 %v1001_v48 }
 0x136   : > { %1670 = vmatprep.mubr.msk.bf16.mxu0 %vm2062_vm0, %v2061_v0  ;;  %1680 = vmatprep.subr.bf16.mxu0 %v2061_v0 }
 0x137   : > { %v1060_v50 = vpop.permute.xlu1 %1059  ;;  %v1058_v51 = vpop.permute.xlu0 %1057  ;;  %1686 = vmatprep.subr.bf16.mxu1 %v2061_v0 }
 0x138   : > { %1677 = vmatmul.mubr.msk.bf16.vlgmr.msra.gmra.mrb[20].mxu1 %vm345_vm1, %v1838_v49  ;;  %v1062_v53 = vsel %vm1061_vm13, %v1058_v51, %v1060_v50 }
 0x139   : > { %1688 = vmatprep.mubr.msk.bf16.mxu1 %vm2062_vm0, %v2061_v0 }
 0x13b   : > { %v1121_v54 = vpop.permute.xlu1 %1120  ;;  %v1119_v55 = vpop.permute.xlu0 %1118 }
 0x13c   : > { %1671 = vmatmul.mubr.msk.bf16.vlgmr.msra.gmra.mrb[20].mxu0 %vm345_vm1, %v1837_v52  ;;  %v1123_v56 = vsel %vm1122_vm14, %v1119_v55, %v1121_v54 }
 0x13d   : > { %1681 = vmatpush3.bf16.msra.mxu0 %v1062_v53  ;;  %1687 = vmatpush3.bf16.msra.mxu1 %v1123_v56 }
 0x13e   : > { %1682 = vmatprep.mubr.msk.bf16.mxu0 %vm2062_vm0, %v2061_v0  ;;  %1692 = vmatprep.subr.bf16.mxu0 %v2061_v0 }
 0x13f   : > { %v1182_v58 = vpop.permute.xlu1 %1181  ;;  %v1180_v59 = vpop.permute.xlu0 %1179  ;;  %1698 = vmatprep.subr.bf16.mxu1 %v2061_v0 }
 0x140   : > { %1689 = vmatmul.mubr.msk.bf16.vlgmr.msra.gmra.mrb[24].mxu1 %vm345_vm1, %v1840_v57  ;;  %v1184_v61 = vsel %vm1183_vm15, %v1180_v59, %v1182_v58 }
 0x141   : > { %1700 = vmatprep.mubr.msk.bf16.mxu1 %vm2062_vm0, %v2061_v0 }
 0x143   : > { %v1243_v62 = vpop.permute.xlu1 %1242  ;;  %v1241_v63 = vpop.permute.xlu0 %1240 }
 0x144   : > { %1683 = vmatmul.mubr.msk.bf16.vlgmr.msra.gmra.mrb[24].mxu0 %vm345_vm1, %v1839_v60  ;;  %v1245_v1 = vsel %vm1244_vm2, %v1241_v63, %v1243_v62 }
 0x145   : > { %1693 = vmatpush3.bf16.msra.mxu0 %v1184_v61  ;;  %1699 = vmatpush3.bf16.msra.mxu1 %v1245_v1 }
 0x146   : > { %1694 = vmatprep.mubr.msk.bf16.mxu0 %vm2062_vm0, %v2061_v0  ;;  %1704 = vmatprep.subr.bf16.mxu0 %v2061_v0 }
 0x147   : > { %v1304_v3 = vpop.permute.xlu1 %1303  ;;  %v1302_v4 = vpop.permute.xlu0 %1301 }
 0x148   : > { %1701 = vmatmul.mubr.msk.bf16.vlgmr.msra.gmra.mrb[28].mxu1 %vm345_vm1, %v1842_v2  ;;  %v1306_v6 = vsel %vm1305_vm3, %v1302_v4, %v1304_v3 }
 0x14c   : > { %1695 = vmatmul.mubr.msk.bf16.vlgmr.msra.gmra.mrb[28].mxu0 %vm345_vm1, %v1841_v5 }
 0x14d   : > { %1705 = vmatpush3.bf16.msra.mxu0 %v1306_v6  ;;  %1706 = vmatprep.mubr.msk.bf16.mxu0 %vm2062_vm0, %v2061_v0 }
 0x154   : > { %1707 = vmatmul.mubr.msk.bf16.vlgmr.msra.gmra.mrb[32].mxu0 %vm345_vm1, %v1843_v7 }
 0x171   : > { %v432_v8 = vpop.f32.mrb[0].mxu1 }
 0x172   : > { %v1618_v9 = vpop.f32.mrb[1].mxu1 }
 0x173   : > { %v435_v10 = vpop.f32.mrb[2].mxu1 }
 0x174   : > { %v1619_v11 = vpop.f32.mrb[3].mxu1 }
 0x1e7   : > { %v383_v12 = vpop.f32.mrb[0].mxu0 }
 0x1e8   : > { %v433_v13 = vadd.f32 %v432_v8, %v383_v12  ;;  %v1612_v14 = vpop.f32.mrb[1].mxu0 }
 0x1e9   : > { %v386_v15 = vpop.f32.mrb[2].mxu0 }
 0x1ea   : > { %v436_v16 = vadd.f32 %v435_v10, %v386_v15  ;;  %v1613_v17 = vpop.f32.mrb[3].mxu0 }
 0x1eb   : > { %v552_v18 = vpop.f32.mrb[4].mxu1 }
 0x1ec   : > { %v1630_v19 = vpop.f32.mrb[5].mxu1 }
 0x1ed   : > { %v555_v20 = vpop.f32.mrb[6].mxu1 }
 0x1ee   : > { %v1631_v21 = vpop.f32.mrb[7].mxu1 }
 0x1ef   : > { %v491_v22 = vpop.f32.mrb[4].mxu0 }
 0x1f0   : > { %v498_v23 = vadd.f32 %v491_v22, %v433_v13  ;;  %v1624_v0 = vpop.f32.mrb[5].mxu0 }
 0x1f1   : > { %v494_v24 = vpop.f32.mrb[6].mxu0 }
 0x1f2   : > { %v499_v25 = vadd.f32 %v494_v24, %v436_v16  ;;  %v559_v26 = vadd.f32 %v552_v18, %v498_v23  ;;  %v1625_v27 = vpop.f32.mrb[7].mxu0 }
 0x1f3   : > { %v674_v28 = vpop.f32.mrb[8].mxu1 }
 0x1f4   : > { %v560_v29 = vadd.f32 %v555_v20, %v499_v25  ;;  %v1642_v30 = vpop.f32.mrb[9].mxu1 }
 0x1f5   : > { %v677_v31 = vpop.f32.mrb[10].mxu1 }
 0x1f6   : > { %v1643_v32 = vpop.f32.mrb[11].mxu1 }
 0x1f7   : > { %v613_v33 = vpop.f32.mrb[8].mxu0 }
 0x1f8   : > { %v620_v34 = vadd.f32 %v613_v33, %v559_v26  ;;  %v1636_v35 = vpop.f32.mrb[9].mxu0 }
 0x1f9   : > { %v616_v36 = vpop.f32.mrb[10].mxu0 }
 0x1fa   : > { %v621_v37 = vadd.f32 %v616_v36, %v560_v29  ;;  %v681_v38 = vadd.f32 %v674_v28, %v620_v34  ;;  %v1637_v39 = vpop.f32.mrb[11].mxu0 }
 0x1fb   : > { %v796_v40 = vpop.f32.mrb[12].mxu1 }
 0x1fc   : > { %v682_v41 = vadd.f32 %v677_v31, %v621_v37  ;;  %v1654_v42 = vpop.f32.mrb[13].mxu1 }
 0x1fd   : > { %v799_v43 = vpop.f32.mrb[14].mxu1  ;;  %v1364_v42 = vpop.permute.xlu1 %1363 }
 0x1fe   : > { %v1655_v44 = vpop.f32.mrb[15].mxu1 }
 0x1ff   : > { %v735_v45 = vpop.f32.mrb[12].mxu0 }
 0x200   : > { %v742_v46 = vadd.f32 %v735_v45, %v681_v38  ;;  %v1648_v47 = vpop.f32.mrb[13].mxu0  ;;  %v1359_v38 = vpop.permute.xlu0 %1358 }
 0x201   : > { %v738_v48 = vpop.f32.mrb[14].mxu0 }
 0x202   : > { %v743_v49 = vadd.f32 %v738_v48, %v682_v41  ;;  %v803_v50 = vadd.f32 %v796_v40, %v742_v46  ;;  %v1649_v51 = vpop.f32.mrb[15].mxu0 }
 0x203   : > { %v918_v52 = vpop.f32.mrb[16].mxu1 }
 0x204   : > { %v804_v53 = vadd.f32 %v799_v43, %v743_v49  ;;  %v1666_v54 = vpop.f32.mrb[17].mxu1 }
 0x205   : > { %v921_v55 = vpop.f32.mrb[18].mxu1 }
 0x206   : > { %v1667_v56 = vpop.f32.mrb[19].mxu1 }
 0x207   : > { %v857_v57 = vpop.f32.mrb[16].mxu0 }
 0x208   : > { %v864_v58 = vadd.f32 %v857_v57, %v803_v50  ;;  %v1660_v59 = vpop.f32.mrb[17].mxu0 }
 0x209   : > { %v860_v60 = vpop.f32.mrb[18].mxu0 }
 0x20a   : > { %v865_v61 = vadd.f32 %v860_v60, %v804_v53  ;;  %v925_v62 = vadd.f32 %v918_v52, %v864_v58  ;;  %v1661_v63 = vpop.f32.mrb[19].mxu0 }
 0x20b   : > { %v1040_v1 = vpop.f32.mrb[20].mxu1 }
 0x20c   : > { %v926_v2 = vadd.f32 %v921_v55, %v865_v61  ;;  %v1678_v3 = vpop.f32.mrb[21].mxu1 }
 0x20d   : > { %v1043_v4 = vpop.f32.mrb[22].mxu1 }
 0x20e   : > { %v1679_v5 = vpop.f32.mrb[23].mxu1 }
 0x20f   : > { %v979_v6 = vpop.f32.mrb[20].mxu0 }
 0x210   : > { %v986_v7 = vadd.f32 %v979_v6, %v925_v62  ;;  %v1672_v8 = vpop.f32.mrb[21].mxu0 }
 0x211   : > { %v982_v9 = vpop.f32.mrb[22].mxu0 }
 0x212   : > { %v987_v10 = vadd.f32 %v982_v9, %v926_v2  ;;  %v1047_v11 = vadd.f32 %v1040_v1, %v986_v7  ;;  %v1673_v12 = vpop.f32.mrb[23].mxu0 }
 0x213   : > { %v1162_v13 = vpop.f32.mrb[24].mxu1 }
 0x214   : > { %v1048_v14 = vadd.f32 %v1043_v4, %v987_v10  ;;  %v1690_v15 = vpop.f32.mrb[25].mxu1 }
 0x215   : > { %v1165_v16 = vpop.f32.mrb[26].mxu1 }
 0x216   : > { %v1691_v17 = vpop.f32.mrb[27].mxu1 }
 0x217   : > { %v1101_v18 = vpop.f32.mrb[24].mxu0 }
 0x218   : > { %v1108_v19 = vadd.f32 %v1101_v18, %v1047_v11  ;;  %v1684_v20 = vpop.f32.mrb[25].mxu0 }
 0x219   : > { %v1104_v21 = vpop.f32.mrb[26].mxu0 }
 0x21a   : > { %v1109_v22 = vadd.f32 %v1104_v21, %v1048_v14  ;;  %v1169_v23 = vadd.f32 %v1162_v13, %v1108_v19  ;;  %v1685_v0 = vpop.f32.mrb[27].mxu0 }
 0x21b   : > { %v1284_v24 = vpop.f32.mrb[28].mxu1 }
 0x21c   : > { %v1170_v25 = vadd.f32 %v1165_v16, %v1109_v22  ;;  %v1702_v26 = vpop.f32.mrb[29].mxu1 }
 0x21d   : > { %v1287_v27 = vpop.f32.mrb[30].mxu1 }
 0x21e   : > { %v1703_v28 = vpop.f32.mrb[31].mxu1 }
 0x21f   : > { %v1223_v29 = vpop.f32.mrb[28].mxu0 }
 0x220   : > { %v1230_v30 = vadd.f32 %v1223_v29, %v1169_v23  ;;  %v1696_v31 = vpop.f32.mrb[29].mxu0 }
 0x221   : > { %v1226_v32 = vpop.f32.mrb[30].mxu0 }
 0x222   : > { %v1231_v33 = vadd.f32 %v1226_v32, %v1170_v25  ;;  %v1291_v34 = vadd.f32 %v1284_v24, %v1230_v30  ;;  %v1697_v35 = vpop.f32.mrb[31].mxu0 }
 0x224   : > { %v1292_v36 = vadd.f32 %v1287_v27, %v1231_v33 }
 0x227   : > { %v1345_v37 = vpop.f32.mrb[32].mxu0 }
 0x228   : > { %v1352_v39 = vadd.f32 %v1345_v37, %v1291_v34  ;;  %v1708_v40 = vpop.f32.mrb[33].mxu0 }
 0x229   : > { %v1348_v41 = vpop.f32.mrb[34].mxu0 }
 0x22a   : > { %v1353_v43 = vadd.f32 %v1348_v41, %v1292_v36  ;;  %v1366_v44 = vadd.f32 %v1359_v38, %v1352_v39  ;;  %v1709_v45 = vpop.f32.mrb[35].mxu0 }
 0x22c   : > { %1368 = vst [vmem:[%s302_s24] sm:$0xff] %v1366_v44  ;;  %v1367_v46 = vadd.f32 %v1364_v42, %v1353_v43 }
 0x22e   : > { %1369 = vst [vmem:[%s302_s24 + $0x8] sm:$0xff] %v1367_v46 }
 0x22f   : > { %1974 = shalt.err (!%p1971_p5)
}
 0x230   : > { %s1975_s0 = scalar_lea.hbm %s2436_s25, 256  ;;  %s1979_s22 = scalar_lea.hbm %s2489_s4, 512 }
 0x231   : > { %p1976_p2 = scmp.ne.s32.totalorder %s2436_s25, %s1975_s0  ;;  %p1980_p9 = scmp.lt.u32.totalorder %s2436_s25, %s2489_s4 }
 0x232   : > { %p1981_p0 = scmp.lt.u32.totalorder %s1979_s22, %s1975_s0  ;;  %p1983_p6 = scmp.lt.u32.totalorder %s1975_s0, %s2436_s25 }
 0x233   : > { %p1977_p3 = pnand %p1976_p2, %p2534_p13 }
 0x234   : > { %p1982_p8 = por %p1981_p0, %p1980_p9 }
 0x235   : > { %p1978_p7 = pneg %p1977_p3 }
 0x236   : > { %p1984_p11 = por %p1983_p6, %p1982_p8 }
 0x238   : > { %p1985_p4 = pnand %p1984_p11, %p1978_p7 }
 0x23a   : > { %1988 = shalt.err (!%p1985_p4)
}
 0x23b   : > { %s2081_s30 = smov 128   ;;  %s2082_s23 = smov 8  }
 0x23c   : > { %1722 = dma.vmem_to_hbm [thread:$0]  (%p2534_p13), %s2431_s14, 256, %s2436_s25, %s1371_s9, %s2081_s30, %s2081_s30, %s2082_s23  }
 0x23d PF: > { %s2535_s6 = sld [smem:[#allocation15_spill]]  ;;  %s1400_s28 = sand.u32 1, %s2031_s15  }
 0x23e   : > { %p2537_p1 = scmp.ge.s32.totalorder %s2051_s20, 2  ;;  %s1401_s24 = scalar_lea.sflag [#allocation5], %s1400_s28 }
 0x243   : > { %p2536_p12 = scmp.ne.s32.totalorder %s2535_s6, 0 }
 0x245   : > { %p1739_p10 = pnand %p2537_p1, %p2536_p12 }
 0x247   : > { %2026 = dma.done.wait (!%p1739_p10), %s1401_s24, 256  }
 0x248   : > { %2028 = vsyncadd (!%p1739_p10), %s1401_s24, 4294967040  ;;  %s19_s20 = sadd.s32 1, %s2051_s20   ;;  %s2538_s21 = sld [smem:[#allocation17_spill]] }
 0x249   : > { %p16_p5 = scmp.ge.s32.totalorder %s19_s20, 4   ;;  %s2539_s26 = sld [smem:[#allocation16_spill]] }
 0x24a   : > { %s2540_s15 = smov %s2035_s16  ;;  %s2541_s16 = smov %s2039_s17 }
 0x24b   : > { %s2543_s18 = smov %s2047_s19  ;;  %18 = sbr.rel (!%p16_p5) target bundleno = 9 (0x9), region = 115 }
 0x24e   : > { %s2542_s17 = smov %s2538_s21 }
 0x24f   : > { %s2544_s19 = smov %s2539_s26 }
 0x252   :  { %1406 = vsyncpa [#allocation4], 1 }
 0x253   :  { %1408 = vsyncpa [#allocation4 + $0x1], 1 }
 0x254   :  { %1409 = vsyncpa [#allocation7], 1 }
 0x255   :  { %1410 = vsyncpa [#allocation5], 1 }
 0x256   :  { %1412 = vsyncpa [#allocation5 + $0x1], 1 }

</bundles_post_ra>
